<compile_context>
chip_gen: v5e
topology: v5e:2x2
jax: 0.10.0
libtpu: 0.0.40
codegen_flags: <defaults>
</compile_context>

<pallas_src>
import jax
import jax.numpy as jnp
from jax import lax
from jax.experimental import pallas as pl
from jax.experimental.pallas import tpu as pltpu


NEG_SLOPE = 0.01  # nn.LeakyReLU default negative_slope
LANE = 128        # TPU lane width


def diff_decoder_kernel(x_ref, w1t_ref, b1w2_ref, b2_ref, o_ref):
    # x:    (tb, H)   native input layout/dtype (batch on sublanes)
    # w1t:  (Hh, H)   compute dtype (PyTorch weight layout W1[out, in], resident)
    # b1w2: (Hh, 2)   f32   column 0 = b1, column 1 = w2
    # b2:   (1, 1)    f32   SMEM scalar
    # o:    (1, tb)   f32   lane-dense output (batch on lanes)
    x = x_ref[...].astype(w1t_ref.dtype)  # in-kernel cast: free VPU filler in a mem-bound kernel
    # Linear 1 as an "NT" matmul contracting H (minor dim of both operands):
    # (Hh, H) . (tb, H)^T -> (Hh, tb), f32 accumulation on the MXU.
    h1 = lax.dot_general(
        w1t_ref[...], x,
        dimension_numbers=(((1,), (1,)), ((), ())),
        preferred_element_type=jnp.float32,
    )
    h1 = h1 + b1w2_ref[:, 0:1]                      # bias column broadcast across batch lanes
    h1 = jnp.where(h1 > 0.0, h1, NEG_SLOPE * h1)    # LeakyReLU (f32)
    # Dropout -> identity in eval mode.
    # Linear 2 (out_features=1): VPU multiply + sublane reduction (keeps MXU free).
    out = jnp.sum(h1 * b1w2_ref[:, 1:2], axis=0, keepdims=True) + b2_ref[0, 0]
    o_ref[...] = out.astype(o_ref.dtype)


def diff_decoder(genes, w1, b1, w2, b2, *, tb=32768, compute_dtype=jnp.bfloat16):
    """genes: (B, H) native layout. w1: (H, H//2) (in x out). Returns (B, 1)."""
    B, H = genes.shape
    Hh = w1.shape[1]

    # --- batch tiling (output batch lives on the lane axis) ---
    B128 = pl.cdiv(B, LANE) * LANE
    tb = max(LANE, min((tb // LANE) * LANE, B128))
    grid_n = pl.cdiv(B, tb)
    # Best-effort even step count for v7x's two TensorCores; only when tiles stay >= 16K
    # lanes so the extra per-step overhead is negligible on single-TC v5e/v6e.
    if grid_n % 2 == 1 and tb >= 2 * 16384:
        tb //= 2
        grid_n = pl.cdiv(B, tb)
    Bp = grid_n * tb  # only the tiny f32 output is padded; genes is read in place

    # --- params (tiny): pack b1 / w2 into one (Hh, 2) operand, b2 as an SMEM scalar ---
    w1t = jnp.asarray(w1).T.astype(compute_dtype)                              # (Hh, H)
    b1w2 = jnp.stack(
        [jnp.asarray(b1).reshape(Hh), jnp.asarray(w2).reshape(Hh)], axis=1
    ).astype(jnp.float32)                                                      # (Hh, 2)
    b2c = jnp.asarray(b2).reshape(1, 1).astype(jnp.float32)                    # (1, 1) SMEM

    # --- VMEM budget: double-buffered genes/output tiles + resident params
    #     + compiler temporaries for the (Hh, tb) f32 intermediates and the cast x tile ---
    in_elt = jnp.dtype(genes.dtype).itemsize
    cd_elt = jnp.dtype(compute_dtype).itemsize
    need = (2 * tb * H * in_elt                      # genes tile (double-buffered)
            + 2 * tb * 4                             # (1, tb) f32 output (double-buffered)
            + 2 * (Hh * H * cd_elt + Hh * 2 * 4)     # resident params
            + 3 * Hh * tb * 4 + tb * H * cd_elt)     # in-kernel temporaries (estimate)
    vmem_limit = int(min(48 << 20, max(16 << 20, need + (12 << 20))))

    out = pl.pallas_call(
        diff_decoder_kernel,
        out_shape=jax.ShapeDtypeStruct((1, Bp), jnp.float32),
        grid_spec=pltpu.PrefetchScalarGridSpec(
            num_scalar_prefetch=0,
            grid=(grid_n,),
            in_specs=[
                pl.BlockSpec((tb, H), lambda j: (j, 0)),            # genes: native contiguous slab
                pl.BlockSpec((Hh, H), lambda j: (0, 0)),            # W1^T (resident)
                pl.BlockSpec((Hh, 2), lambda j: (0, 0)),            # [b1 | w2] (resident)
                pl.BlockSpec(memory_space=pltpu.MemorySpace.SMEM),  # b2 scalar
            ],
            out_specs=pl.BlockSpec((1, tb), lambda j: (0, j)),      # lane-dense output
        ),
        compiler_params=pltpu.CompilerParams(
            dimension_semantics=("parallel",),
            vmem_limit_bytes=vmem_limit,
        ),
    )(genes, w1t, b1w2, b2c)

    return out[0, :B].reshape(B, 1).astype(genes.dtype)


def init_params(key, hidden_dim):
    """Deterministic parameter init matching nn.Linear shapes, stored pre-transposed
    as (in_features, out_features)."""
    h = hidden_dim
    hh = h // 2
    k1, k2, k3, k4 = jax.random.split(key, 4)
    lim1 = 1.0 / jnp.sqrt(h)
    lim2 = 1.0 / jnp.sqrt(hh)
    w1 = jax.random.uniform(k1, (h, hh), jnp.float32, -lim1, lim1)
    b1 = jax.random.uniform(k2, (1, hh), jnp.float32, -lim1, lim1)
    w2 = jax.random.uniform(k3, (hh, 1), jnp.float32, -lim2, lim2)
    b2 = jax.random.uniform(k4, (1, 1), jnp.float32, -lim2, lim2)
    return w1, b1, w2, b2


def reference(genes, w1, b1, w2, b2, compute_dtype=None):
    x, W1 = genes, w1
    if compute_dtype is not None:
        x = x.astype(compute_dtype).astype(jnp.float32)
        W1 = W1.astype(compute_dtype).astype(jnp.float32)
    h1 = jnp.dot(x, W1, precision=jax.lax.Precision.HIGHEST) + b1.reshape(1, -1)
    h1 = jnp.where(h1 > 0, h1, NEG_SLOPE * h1)
    return (jnp.dot(h1, w2.reshape(-1, 1), precision=jax.lax.Precision.HIGHEST)
            + b2.reshape(1, 1))


if __name__ == "__main__":
    hidden_dim = 32
    batch = 8

    key = jax.random.PRNGKey(0)
    k_params, k_x, k_x2 = jax.random.split(key, 3)
    w1, b1, w2, b2 = init_params(k_params, hidden_dim)
    genes = jax.random.normal(k_x, (batch, hidden_dim), jnp.float32)

    # f32 path: tight check against the pure-JAX reference.
    out_f32 = jax.block_until_ready(
        diff_decoder(genes, w1, b1, w2, b2, compute_dtype=jnp.float32))
    ref_f32 = reference(genes, w1, b1, w2, b2)
    assert out_f32.shape == (batch, 1), out_f32.shape
    assert jnp.allclose(out_f32, ref_f32, atol=1e-4, rtol=1e-4), "f32 mismatch vs reference"

    # default bf16-compute path (in-kernel cast, f32 accumulation).
    out_bf16 = jax.block_until_ready(diff_decoder(genes, w1, b1, w2, b2))
    ref_bf16 = reference(genes, w1, b1, w2, b2, compute_dtype=jnp.bfloat16)
    assert out_bf16.shape == (batch, 1), out_bf16.shape
    assert jnp.allclose(out_bf16, ref_bf16, atol=1e-3, rtol=1e-3), "bf16 mismatch vs cast reference"
    assert jnp.allclose(out_bf16, ref_f32, atol=1e-1, rtol=1e-1), "bf16 far from f32 reference"

    # multi-step grid with a ragged last block (B not a multiple of the tile): f32 check.
    batch2 = 300
    genes2 = jax.random.normal(k_x2, (batch2, hidden_dim), jnp.float32)
    out2 = jax.block_until_ready(
        diff_decoder(genes2, w1, b1, w2, b2, tb=128, compute_dtype=jnp.float32))
    ref2 = reference(genes2, w1, b1, w2, b2)
    assert out2.shape == (batch2, 1), out2.shape
    assert jnp.allclose(out2, ref2, atol=1e-4, rtol=1e-4), "ragged multi-step mismatch"

    print("KERNEL_OK")
</pallas_src>

<mosaic_0001>
module attributes {stable_mosaic.version = 11 : i64} {
  func.func @diff_decoder_kernel(%arg0: i32, %arg1: memref<128x32xf32, #tpu.memory_space<vmem>>, %arg2: memref<16x32xf32, #tpu.memory_space<vmem>>, %arg3: memref<16x2xf32, #tpu.memory_space<vmem>>, %arg4: memref<1x1xf32, #tpu.memory_space<smem>>, %arg5: memref<1x128xf32, #tpu.memory_space<vmem>>) attributes {dimension_semantics = [#tpu.dimension_semantics<parallel>], iteration_bounds = array<i64: 1>, scalar_prefetch = 0 : i64, scratch_operands = 0 : i64, tpu.core_type = #tpu.core_type<tc>, window_params = [{transform_indices = @transform_0, window_bounds = array<i64: 128, 32>}, {pipeline_mode = #tpu.pipeline_mode<synchronous>, transform_indices = @transform_1, window_bounds = array<i64: 16, 32>}, {pipeline_mode = #tpu.pipeline_mode<synchronous>, transform_indices = @transform_2, window_bounds = array<i64: 16, 2>}, {transform_indices = @transform_3, window_bounds = array<i64: 1, 1>}, {transform_indices = @transform_4, window_bounds = array<i64: 1, 128>}]} {
    %c0 = arith.constant 0 : index
    %c0_0 = arith.constant 0 : index
    %0 = vector.load %arg1[%c0, %c0_0] : memref<128x32xf32, #tpu.memory_space<vmem>>, vector<128x32xf32>
    %c0_1 = arith.constant 0 : index
    %c0_2 = arith.constant 0 : index
    %1 = vector.load %arg2[%c0_1, %c0_2] : memref<16x32xf32, #tpu.memory_space<vmem>>, vector<16x32xf32>
    %cst = arith.constant dense<0.000000e+00> : vector<16x128xf32>
    %2 = tpu.matmul %1, %0, %cst {dimension_numbers = #tpu.dot_dimension_numbers<[1], [1], [0], [0], [0, 0, 1, 0], [], []>} : vector<16x32xf32>, vector<128x32xf32>, vector<16x128xf32> -> vector<16x128xf32>
    %c0_3 = arith.constant 0 : index
    %c0_4 = arith.constant 0 : index
    %3 = vector.load %arg3[%c0_3, %c0_4] : memref<16x2xf32, #tpu.memory_space<vmem>>, vector<16x1xf32>
    %4 = vector.broadcast %3 : vector<16x1xf32> to vector<16x128xf32>
    %5 = arith.addf %2, %4 : vector<16x128xf32>
    %cst_5 = arith.constant 0.000000e+00 : f32
    %6 = vector.broadcast %cst_5 : f32 to vector<16x128xf32>
    %7 = arith.cmpf ogt, %5, %6 : vector<16x128xf32>
    %cst_6 = arith.constant 0.00999999977 : f32
    %8 = vector.broadcast %cst_6 : f32 to vector<16x128xf32>
    %9 = arith.mulf %8, %5 : vector<16x128xf32>
    %10 = arith.select %7, %5, %9 : vector<16x128xi1>, vector<16x128xf32>
    %c0_7 = arith.constant 0 : index
    %c1 = arith.constant 1 : index
    %11 = vector.load %arg3[%c0_7, %c1] : memref<16x2xf32, #tpu.memory_space<vmem>>, vector<16x1xf32>
    %12 = vector.broadcast %11 : vector<16x1xf32> to vector<16x128xf32>
    %13 = arith.mulf %10, %12 : vector<16x128xf32>
    %cst_8 = arith.constant dense<0.000000e+00> : vector<128xf32>
    %14 = vector.multi_reduction <add>, %13, %cst_8 [0] : vector<16x128xf32> to vector<128xf32>
    %15 = vector.shape_cast %14 : vector<128xf32> to vector<1x128xf32>
    %c0_9 = arith.constant 0 : index
    %c0_10 = arith.constant 0 : index
    %16 = memref.load %arg4[%c0_9, %c0_10] : memref<1x1xf32, #tpu.memory_space<smem>>
    %17 = vector.broadcast %16 : f32 to vector<1x128xf32>
    %18 = arith.addf %15, %17 : vector<1x128xf32>
    %c0_11 = arith.constant 0 : index
    %c0_12 = arith.constant 0 : index
    %19 = vector.load %arg5[%c0_11, %c0_12] : memref<1x128xf32, #tpu.memory_space<vmem>>, vector<1x128xf32>
    tpu.vector_store %arg5[%c0_11, %c0_12], %18 {strides = array<i32>} : memref<1x128xf32, #tpu.memory_space<vmem>>, vector<1x128xf32>,
    return
  }
  func.func @transform_0(%arg0: i32) -> (i32, i32) {
    %c0_i32 = arith.constant 0 : i32
    %c0_i32_0 = arith.constant 0 : i32
    return %arg0, %c0_i32 : i32, i32
  }
  func.func @transform_1(%arg0: i32) -> (i32, i32) {
    %c0_i32 = arith.constant 0 : i32
    %c0_i32_0 = arith.constant 0 : i32
    %c0_i32_1 = arith.constant 0 : i32
    return %c0_i32, %c0_i32_0 : i32, i32
  }
  func.func @transform_2(%arg0: i32) -> (i32, i32) {
    %c0_i32 = arith.constant 0 : i32
    %c0_i32_0 = arith.constant 0 : i32
    %c0_i32_1 = arith.constant 0 : i32
    return %c0_i32, %c0_i32_0 : i32, i32
  }
  func.func @transform_3(%arg0: i32) -> (i32, i32) {
    %c0_i32 = arith.constant 0 : i32
    %c0_i32_0 = arith.constant 0 : i32
    %c0_i32_1 = arith.constant 0 : i32
    return %c0_i32, %c0_i32_0 : i32, i32
  }
  func.func @transform_4(%arg0: i32) -> (i32, i32) {
    %c0_i32 = arith.constant 0 : i32
    %c0_i32_0 = arith.constant 0 : i32
    return %c0_i32, %arg0 : i32, i32
  }
}

</mosaic_0001>

<bundles_post_ra>
// kernel: tpu_custom_call.1
= control target key start
LH: loop header
LB: loop body
LE: loop exit
PB: predicated region body
PF: predicated region fallthrough
CT: control target
= control target key end

     0   :  { %10 = vsyncpa [#allocation4], 0  ;;  %s368_s0 = inlined_call_operand.hbm [shape: f32[8,32], index: 0, kind: input, shape index: {}]   ;;  %s369_s1 = inlined_call_operand.vmem [shape: f32[16,32], index: 1, kind: input, shape index: {}]   ;;  %s370_s2 = inlined_call_operand.vmem [shape: f32[16,2], index: 2, kind: input, shape index: {}]   ;;  %s371_s3 = inlined_call_operand.<no memory space> [shape: f32[1,1], index: 3, kind: input, shape index: {}]   ;;  %s372_s4 = inlined_call_operand.hbm [shape: f32[1,128], index: 4, kind: output, shape index: {}]  }
   0x1   :  { %11 = vsyncpa [#allocation5], 0 }
   0x2   :  { %15 = vsyncadd [#allocation4], 1920  ;;  %s16_s17 = sshll.u32 %s368_s0, 4  ;;  %s282_s18 = smov [#allocation3]   ;;  %s17_s17 = int_to_ptr.hbm [resolvable:$true] %s16_s17 }
   0x3   :  { %s18_s19 = sshll.u32 %s282_s18, 4  ;;  %s283_s20 = smov 128   ;;  %s19_s19 = int_to_ptr.vmem [resolvable:$true] %s18_s19 }
   0x4   :  { %s284_s21 = smov 8  }
   0x5   :  { %24 = dma.hbm_to_vmem [thread:$0]  %s17_s17, 128, %s19_s19, [#allocation4], %s283_s20, %s283_s20, %s284_s21  }
   0x6   :  { %278 = dma.done.wait [#allocation4], 2048  }
   0x7   :  { %279 = vsyncadd [#allocation4], 4294965248  ;;  %vm65_vm0 = vcmask 261120   ;;  %v50_v0 = vld [vmem:[#allocation3 + $0x78] sm:$0xff]  ;;  %v49_v1 = vld [vmem:[#allocation3 + $0x70] sm:$0xff]  ;;  %v285_v9 = vmov 0   ;;  %v167_v42 = vstv %s371_s3 }
   0x8   :  { %187 = vmatpush.xpose.msk.msra.mxu0 %vm65_vm0, %v50_v0  ;;  %205 = vmatpush.xpose.msk.msra.mxu1 %vm65_vm0, %v50_v0  ;;  %v48_v2 = vld [vmem:[#allocation3 + $0x68] sm:$0xff]  ;;  %v47_v3 = vld [vmem:[#allocation3 + $0x60] sm:$0xff]  ;;  %v46_v4 = vld [vmem:[#allocation3 + $0x58] sm:$0xff]  ;;  %v286_v11 = vmov 1   ;;  %s287_s29 = smov [#allocation6]   ;;  %s177_s7 = sshll.u32 %s372_s4, 4  ;;  %s178_s7 = int_to_ptr.hbm [resolvable:$true] %s177_s7 }
   0x9   :  { %v45_v5 = vld [vmem:[#allocation3 + $0x50] sm:$0xff]  ;;  %v44_v6 = vld [vmem:[#allocation3 + $0x48] sm:$0xff]  ;;  %v53_v7 = vld [vmem:[%s370_s2] sm:$0xff]  ;;  %227 = vset.pattern.permute.xlu0 %v285_v9  ;;  %228 = vset.pattern.permute.xlu1 %v286_v11  ;;  %s175_s30 = sshll.u32 %s287_s29, 4  ;;  %s176_s30 = int_to_ptr.vmem [resolvable:$true] %s175_s30 }
   0xa   :  { %v43_v8 = vld [vmem:[#allocation3 + $0x40] sm:$0xff]  ;;  %57 = vperm.xlu0 %227, %v53_v7   ;;  %v42_v10 = vld [vmem:[#allocation3 + $0x38] sm:$0xff]  ;;  %150 = vperm.xlu1 %228, %v53_v7   ;;  %v54_v12 = vld [vmem:[%s370_s2 + $0x8] sm:$0xff] }
   0xb   :  { %v41_v13 = vld [vmem:[#allocation3 + $0x30] sm:$0xff]  ;;  %v40_v14 = vld [vmem:[#allocation3 + $0x28] sm:$0xff]  ;;  %v39_v15 = vld [vmem:[#allocation3 + $0x20] sm:$0xff] }
   0xc   :  { %188 = vmatpush.xpose.msk.msra.mxu0 %vm65_vm0, %v49_v1  ;;  %206 = vmatpush.xpose.msk.msra.mxu1 %vm65_vm0, %v49_v1  ;;  %v38_v16 = vld [vmem:[#allocation3 + $0x18] sm:$0xff]  ;;  %v37_v17 = vld [vmem:[#allocation3 + $0x10] sm:$0xff]  ;;  %v36_v18 = vld [vmem:[#allocation3 + $0x8] sm:$0xff] }
   0xd   :  { %v35_v19 = vld [vmem:[#allocation3] sm:$0xff]  ;;  %v52_v21 = vld [vmem:[%s369_s1 + $0x8] sm:$0xff] }
   0xe   :  { %v51_v20 = vld [vmem:[%s369_s1] sm:$0xff] }
  0x10   :  { %189 = vmatpush.xpose.msk.msra.mxu0 %vm65_vm0, %v48_v2  ;;  %207 = vmatpush.xpose.msk.msra.mxu1 %vm65_vm0, %v48_v2 }
  0x12   :  { %62 = vperm.xlu0 %227, %v54_v12   ;;  %154 = vperm.xlu1 %228, %v54_v12  }
  0x14   :  { %190 = vmatpush.xpose.msk.msra.mxu0 %vm65_vm0, %v47_v3  ;;  %208 = vmatpush.xpose.msk.msra.mxu1 %vm65_vm0, %v47_v3 }
  0x18   :  { %191 = vmatpush.xpose.msk.msra.mxu0 %vm65_vm0, %v46_v4  ;;  %209 = vmatpush.xpose.msk.msra.mxu1 %vm65_vm0, %v46_v4 }
  0x1a   :  { %229 = vset.pattern.permute.xlu0 %v286_v11 }
  0x1c   :  { %192 = vmatpush.xpose.msk.msra.mxu0 %vm65_vm0, %v45_v5  ;;  %210 = vmatpush.xpose.msk.msra.mxu1 %vm65_vm0, %v45_v5 }
  0x20   :  { %193 = vmatpush.xpose.msk.msra.mxu0 %vm65_vm0, %v44_v6  ;;  %211 = vmatpush.xpose.msk.msra.mxu1 %vm65_vm0, %v44_v6 }
  0x24   :  { %194 = vmatpush.xpose.msk.msra.mxu0 %vm65_vm0, %v43_v8  ;;  %212 = vmatpush.xpose.msk.msra.mxu1 %vm65_vm0, %v43_v8 }
  0x28   :  { %195 = vmatpush.xpose.msk.msra.mxu0 %vm65_vm0, %v42_v10  ;;  %213 = vmatpush.xpose.msk.msra.mxu1 %vm65_vm0, %v42_v10 }
  0x2c   :  { %196 = vmatpush.xpose.msk.msra.mxu0 %vm65_vm0, %v41_v13  ;;  %214 = vmatpush.xpose.msk.msra.mxu1 %vm65_vm0, %v41_v13 }
  0x30   :  { %197 = vmatpush.xpose.msk.msra.mxu0 %vm65_vm0, %v40_v14  ;;  %215 = vmatpush.xpose.msk.msra.mxu1 %vm65_vm0, %v40_v14 }
  0x34   :  { %198 = vmatpush.xpose.msk.msra.mxu0 %vm65_vm0, %v39_v15  ;;  %216 = vmatpush.xpose.msk.msra.mxu1 %vm65_vm0, %v39_v15 }
  0x38   :  { %199 = vmatpush.xpose.msk.msra.mxu0 %vm65_vm0, %v38_v16  ;;  %217 = vmatpush.xpose.msk.msra.mxu1 %vm65_vm0, %v38_v16 }
  0x3c   :  { %200 = vmatpush.xpose.msk.msra.mxu0 %vm65_vm0, %v37_v17  ;;  %218 = vmatpush.xpose.msk.msra.mxu1 %vm65_vm0, %v37_v17 }
  0x40   :  { %201 = vmatpush.xpose.msk.msra.mxu0 %vm65_vm0, %v36_v18  ;;  %219 = vmatpush.xpose.msk.msra.mxu1 %vm65_vm0, %v36_v18 }
  0x44   :  { %202 = vmatpush.xpose.msk.msra.mxu0 %vm65_vm0, %v35_v19  ;;  %220 = vmatpush.xpose.msk.msra.mxu1 %vm65_vm0, %v35_v19 }
  0x47   :  { %203 = vmatmul.msk.f32.vlgmr.msra.gmra.mxu0 %vm65_vm0, %v51_v20  ;;  %204 = vmatmul.msk.f32.vlgmr.msra.gmra.mxu1 %vm65_vm0, %v52_v21 }
  0x7c   :  { %v58_v22 = vpop.permute.xlu0 %57  ;;  %v151_v23 = vpop.permute.xlu1 %150 }
  0x84   :  { %v63_v24 = vpop.permute.xlu0 %62  ;;  %v155_v31 = vpop.permute.xlu1 %154 }
  0xc4   :  { %v137_v25 = vpop.f32.mrf.mxu0  ;;  %v140_v26 = vpop.f32.mrf.mxu1 }
  0xc5   :  { %v138_v27 = vadd.f32 %v137_v25, %v58_v22  ;;  %v141_v28 = vadd.f32 %v140_v26, %v63_v24 }
  0xc7   :  { %vm143_vm1 = vcmp.gt.f32.partialorder %v138_v27, 0.0  ;;  %v145_v29 = vmul.f32 0.01, %v138_v27  ;;  %vm144_vm2 = vcmp.gt.f32.partialorder %v141_v28, 0.0  ;;  %v146_v30 = vmul.f32 0.01, %v141_v28 }
  0xc9   :  { %v147_v32 = vsel %vm143_vm1, %v138_v27, %v145_v29  ;;  %v148_v33 = vsel %vm144_vm2, %v141_v28, %v146_v30 }
  0xca   :  { %v157_v34 = vmul.f32 %v151_v23, %v147_v32  ;;  %v158_v35 = vmul.f32 %v155_v31, %v148_v33 }
  0xcc   :  { %v159_v36 = vadd.f32 %v158_v35, %v157_v34 }
  0xce   :  { %v160_v37 = vrot.slane %v159_v36, 4 }
  0xd0   :  { %v161_v38 = vadd.f32 %v160_v37, %v159_v36 }
  0xd2   :  { %v162_v39 = vrot.slane %v161_v38, 2 }
  0xd4   :  { %v163_v40 = vadd.f32 %v162_v39, %v161_v38 }
  0xd6   :  { %v164_v41 = vrot.slane %v163_v40, 1 }
  0xd8   :  { %v165_v43 = vadd.f32 %v164_v41, %v163_v40 }
  0xda   :  { %v168_v44 = vadd.f32 %v167_v42, %v165_v43 }
  0xdc   :  { %169 = vst [vmem:[#allocation6] sm:$0x1] %v168_v44 }
  0xdd   :  { %180 = dma.vmem_to_hbm [thread:$0]  %s176_s30, 16, %s178_s7, [#allocation5]  }
  0xde   :  { %280 = dma.done.wait [#allocation5], 16  }
  0xdf   :  { %281 = vsyncadd [#allocation5], 4294967280 }
  0xe0   :  { %185 = vsyncpa [#allocation4], 1 }
  0xe1   :  { %186 = vsyncpa [#allocation5], 1 }

</bundles_post_ra>
